<compile_context>
chip_gen: v5e
topology: v5e:2x2
jax: 0.10.0
libtpu: 0.0.40
codegen_flags: <defaults>
</compile_context>

<pallas_src>
import functools

import jax
import jax.numpy as jnp
from jax import lax
from jax.experimental import pallas as pl
from jax.experimental.pallas import tpu as pltpu


def _mlp_kernel(x_ref, w1_ref, b1_ref, w2_ref, b2_ref, w3t_ref, b3_ref, o_ref):
    x = x_ref[...]                                            # (block_m, in_size) bf16

    # Layer 1: Linear(inputSize, 64) + ReLU  (MXU, f32 accumulation)
    h1 = jnp.dot(x, w1_ref[...], preferred_element_type=jnp.float32) + b1_ref[...]
    h1 = jnp.maximum(h1, 0.0)                                 # (block_m, 64) f32

    # Dropout(0.1): identity in eval mode.

    # Layer 2: Linear(64, 32) + ReLU  (MXU, f32 accumulation)
    h2 = jnp.dot(h1.astype(w2_ref.dtype), w2_ref[...],
                 preferred_element_type=jnp.float32) + b2_ref[...]
    h2 = jnp.maximum(h2, 0.0)                                 # (block_m, 32) f32

    # Layer 3: Linear(32, 1) as an MXU contraction against the pre-transposed
    # (1, 32) w3, producing the lane-dense (1, block_m) row directly (batch on
    # the 128-lane axis) -- no XLU transpose / sublane reduce.
    out_row = lax.dot_general(
        w3t_ref[...], h2.astype(w3t_ref.dtype),
        dimension_numbers=(((1,), (1,)), ((), ())),
        preferred_element_type=jnp.float32) + b3_ref[...]     # (1, block_m) f32

    o_ref[...] = out_row.reshape(o_ref.shape).astype(o_ref.dtype)


def _round_up(x, m):
    return (x + m - 1) // m * m


def _vmem_limit_bytes(block_m, in_size, stream_itemsize):
    """Conservative scoped-VMEM request (lane-padded buffers, 2x headroom)."""
    f32 = 4
    lane = 128

    def lanes(n):
        return _round_up(max(int(n), 1), lane)

    x_buf = 2 * block_m * lanes(in_size) * stream_itemsize       # double-buffered x tile
    out_buf = 2 * 8 * block_m * f32                              # (1,1,block_m) out row, 8-sublane padded
    weights = 2 * (_round_up(in_size, 8) * lanes(64) + lanes(64)
                   + 64 * lanes(32) + lanes(32) + lanes(32) + lane) * f32
    # h1 / h2 in f32 plus their bf16 copies; all lane-padded to 128.
    inter = block_m * lane * (2 * f32 + 2 * stream_itemsize)
    need = x_buf + out_buf + weights + inter
    # 2x headroom for Mosaic internal scratch; cap at 48 MiB so the kernel
    # still places inside v7x's 64 MiB physical VMEM.
    return int(min(max(2 * need, 16 << 20), 48 << 20))


@functools.partial(jax.jit, static_argnames=("block_m", "stream_dtype"))
def f1_predictor_forward(x, params, block_m=4096, stream_dtype=jnp.bfloat16):
    """x: (batch, inputSize) -> (batch, 1) float32 (eval mode)."""
    w1, b1, w2, b2, w3, b3 = params
    batch, in_size = x.shape
    d1, d2 = w1.shape[1], w2.shape[1]

    # Stream x / weights in bf16 (halves the dominant HBM traffic); biases and
    # all accumulation stay f32.  Callers should pass x already in
    # `stream_dtype` to avoid this extra cast copy.
    x = x.astype(stream_dtype)
    w1 = w1.astype(stream_dtype)
    w2 = w2.astype(stream_dtype)
    w3t = w3.reshape(1, -1).astype(stream_dtype)      # (1, 32): lane-dense row
    b1 = b1.astype(jnp.float32)
    b2 = b2.astype(jnp.float32)
    b3 = b3.astype(jnp.float32)

    # ---- batch tiling -------------------------------------------------------
    # Big tiles amortize the ~0.35us per-grid-step cost; 128-row granularity
    # keeps the output block lane-dense.  Cap block_m so the VMEM estimate
    # stays well under the 48 MiB request.
    block_m = max(128, min(block_m, 16 * 1024))
    block_m = min(block_m, _round_up(batch, 128))
    if batch > 128:
        # >= 2 grid steps so the "parallel" batch axis feeds both v7x cores.
        block_m = max(128, min(block_m, _round_up(pl.cdiv(batch, 2), 128)))
    grid_m = pl.cdiv(batch, block_m)

    if batch < block_m:
        # Tiny batch: pad to a single tile (cheap at this size).  Larger
        # non-divisible batches use Pallas' partial edge block instead of an
        # extra HBM copy of x; the garbage tail rows are row-independent and
        # sliced off below.
        x = jnp.pad(x, ((0, block_m - batch), (0, 0)))

    tile_map = lambda i: (i, 0)
    full_map = lambda i: (0, 0)   # constant block index -> fetched once, VMEM-resident

    out = pl.pallas_call(
        _mlp_kernel,
        out_shape=jax.ShapeDtypeStruct((grid_m, 1, block_m), jnp.float32),
        grid_spec=pltpu.PrefetchScalarGridSpec(
            num_scalar_prefetch=0,
            grid=(grid_m,),
            in_specs=[
                pl.BlockSpec((block_m, in_size), tile_map),   # x tile
                pl.BlockSpec((in_size, d1), full_map),        # W1
                pl.BlockSpec((1, d1), full_map),              # b1
                pl.BlockSpec((d1, d2), full_map),             # W2
                pl.BlockSpec((1, d2), full_map),              # b2
                pl.BlockSpec((1, d2), full_map),              # W3^T
                pl.BlockSpec((1, 1), full_map),               # b3
            ],
            out_specs=pl.BlockSpec((1, 1, block_m), lambda i: (i, 0, 0)),
        ),
        compiler_params=pltpu.CompilerParams(
            dimension_semantics=("parallel",),   # shards batch tiles across TCs on v7x
            vmem_limit_bytes=_vmem_limit_bytes(
                block_m, in_size, jnp.dtype(stream_dtype).itemsize),
        ),
    )(x, w1, b1, w2, b2, w3t, b3)

    # (grid_m, 1, block_m) -> (grid_m*block_m, 1) -> (batch, 1)
    return out.reshape(grid_m * block_m, 1)[:batch]


def init_params(key, input_size):
    """Deterministic init matching nn.Linear default (uniform +/- 1/sqrt(fan_in))."""
    dims = [(input_size, 64), (64, 32), (32, 1)]
    params = []
    for i, (fan_in, fan_out) in enumerate(dims):
        kw, kb = jax.random.split(jax.random.fold_in(key, i))
        bound = 1.0 / (fan_in ** 0.5)
        w = jax.random.uniform(kw, (fan_in, fan_out), jnp.float32, -bound, bound)
        b = jax.random.uniform(kb, (1, fan_out), jnp.float32, -bound, bound)
        params += [w, b]
    return tuple(params)


def reference_forward(x, params):
    """Plain-JAX f32 reference of the same forward pass (eval mode)."""
    w1, b1, w2, b2, w3, b3 = params
    h1 = jnp.maximum(x @ w1 + b1, 0.0)
    h2 = jnp.maximum(h1 @ w2 + b2, 0.0)
    return h2 @ w3 + b3


if __name__ == "__main__":
    key = jax.random.PRNGKey(0)
    input_size = 32   # number of feature columns (inputSize = X.shape[1])
    batch = 8

    kx, kp = jax.random.split(key)
    x = jax.random.normal(kx, (batch, input_size), jnp.float32)
    params = init_params(kp, input_size)

    out = f1_predictor_forward(x, params)
    out = jax.block_until_ready(out)

    ref = reference_forward(x, params)
    assert out.shape == (batch, 1)
    assert bool(jnp.all(jnp.isfinite(out)))
    # bf16-streamed inputs/weights vs f32 reference: tolerance loosened to
    # cover the ~0.2-1% bf16 quantization error (outputs are O(0.1) here).
    assert jnp.allclose(out, ref, atol=3e-2, rtol=3e-2), (out, ref)

    print("KERNEL_OK")
</pallas_src>

<mosaic_0001>
module attributes {stable_mosaic.version = 11 : i64} {
  func.func @_mlp_kernel(%arg0: i32, %arg1: memref<128x32xbf16, #tpu.memory_space<vmem>>, %arg2: memref<32x64xbf16, #tpu.memory_space<vmem>>, %arg3: memref<1x64xf32, #tpu.memory_space<vmem>>, %arg4: memref<64x32xbf16, #tpu.memory_space<vmem>>, %arg5: memref<1x32xf32, #tpu.memory_space<vmem>>, %arg6: memref<1x32xbf16, #tpu.memory_space<vmem>>, %arg7: memref<1x1xf32, #tpu.memory_space<vmem>>, %arg8: memref<1x1x128xf32, #tpu.memory_space<vmem>>) attributes {dimension_semantics = [#tpu.dimension_semantics<parallel>], iteration_bounds = array<i64: 1>, scalar_prefetch = 0 : i64, scratch_operands = 0 : i64, tpu.core_type = #tpu.core_type<tc>, window_params = [{transform_indices = @transform_0, window_bounds = array<i64: 128, 32>}, {pipeline_mode = #tpu.pipeline_mode<synchronous>, transform_indices = @transform_1, window_bounds = array<i64: 32, 64>}, {pipeline_mode = #tpu.pipeline_mode<synchronous>, transform_indices = @transform_2, window_bounds = array<i64: 1, 64>}, {pipeline_mode = #tpu.pipeline_mode<synchronous>, transform_indices = @transform_3, window_bounds = array<i64: 64, 32>}, {pipeline_mode = #tpu.pipeline_mode<synchronous>, transform_indices = @transform_4, window_bounds = array<i64: 1, 32>}, {pipeline_mode = #tpu.pipeline_mode<synchronous>, transform_indices = @transform_5, window_bounds = array<i64: 1, 32>}, {pipeline_mode = #tpu.pipeline_mode<synchronous>, transform_indices = @transform_6, window_bounds = array<i64: 1, 1>}, {transform_indices = @transform_7, window_bounds = array<i64: 1, 1, 128>}]} {
    %c0 = arith.constant 0 : index
    %c0_0 = arith.constant 0 : index
    %0 = vector.load %arg1[%c0, %c0_0] : memref<128x32xbf16, #tpu.memory_space<vmem>>, vector<128x32xbf16>
    %c0_1 = arith.constant 0 : index
    %c0_2 = arith.constant 0 : index
    %1 = vector.load %arg2[%c0_1, %c0_2] : memref<32x64xbf16, #tpu.memory_space<vmem>>, vector<32x64xbf16>
    %cst = arith.constant dense<0.000000e+00> : vector<128x64xf32>
    %2 = tpu.matmul %0, %1, %cst {dimension_numbers = #tpu.dot_dimension_numbers<[1], [0], [0], [1], [0, 0, 1, 1], [], []>} : vector<128x32xbf16>, vector<32x64xbf16>, vector<128x64xf32> -> vector<128x64xf32>
    %c0_3 = arith.constant 0 : index
    %c0_4 = arith.constant 0 : index
    %3 = vector.load %arg3[%c0_3, %c0_4] : memref<1x64xf32, #tpu.memory_space<vmem>>, vector<1x64xf32>
    %4 = vector.broadcast %3 : vector<1x64xf32> to vector<128x64xf32>
    %5 = arith.addf %2, %4 : vector<128x64xf32>
    %cst_5 = arith.constant 0.000000e+00 : f32
    %6 = vector.broadcast %cst_5 : f32 to vector<128x64xf32>
    %7 = arith.maximumf %5, %6 : vector<128x64xf32>
    %8 = arith.truncf %7 : vector<128x64xf32> to vector<128x64xbf16>
    %c0_6 = arith.constant 0 : index
    %c0_7 = arith.constant 0 : index
    %9 = vector.load %arg4[%c0_6, %c0_7] : memref<64x32xbf16, #tpu.memory_space<vmem>>, vector<64x32xbf16>
    %cst_8 = arith.constant dense<0.000000e+00> : vector<128x32xf32>
    %10 = tpu.matmul %8, %9, %cst_8 {dimension_numbers = #tpu.dot_dimension_numbers<[1], [0], [0], [1], [0, 0, 1, 1], [], []>} : vector<128x64xbf16>, vector<64x32xbf16>, vector<128x32xf32> -> vector<128x32xf32>
    %c0_9 = arith.constant 0 : index
    %c0_10 = arith.constant 0 : index
    %11 = vector.load %arg5[%c0_9, %c0_10] : memref<1x32xf32, #tpu.memory_space<vmem>>, vector<1x32xf32>
    %12 = vector.broadcast %11 : vector<1x32xf32> to vector<128x32xf32>
    %13 = arith.addf %10, %12 : vector<128x32xf32>
    %cst_11 = arith.constant 0.000000e+00 : f32
    %14 = vector.broadcast %cst_11 : f32 to vector<128x32xf32>
    %15 = arith.maximumf %13, %14 : vector<128x32xf32>
    %c0_12 = arith.constant 0 : index
    %c0_13 = arith.constant 0 : index
    %16 = vector.load %arg6[%c0_12, %c0_13] : memref<1x32xbf16, #tpu.memory_space<vmem>>, vector<1x32xbf16>
    %17 = arith.truncf %15 : vector<128x32xf32> to vector<128x32xbf16>
    %cst_14 = arith.constant dense<0.000000e+00> : vector<1x128xf32>
    %18 = tpu.matmul %16, %17, %cst_14 {dimension_numbers = #tpu.dot_dimension_numbers<[1], [1], [0], [0], [0, 0, 1, 0], [], []>} : vector<1x32xbf16>, vector<128x32xbf16>, vector<1x128xf32> -> vector<1x128xf32>
    %c0_15 = arith.constant 0 : index
    %c0_16 = arith.constant 0 : index
    %19 = vector.load %arg7[%c0_15, %c0_16] : memref<1x1xf32, #tpu.memory_space<vmem>>, vector<1x1xf32>
    %20 = vector.broadcast %19 : vector<1x1xf32> to vector<1x128xf32>
    %21 = arith.addf %18, %20 : vector<1x128xf32>
    %22 = vector.shape_cast %21 : vector<1x128xf32> to vector<1x1x128xf32>
    %c0_17 = arith.constant 0 : index
    %c0_18 = arith.constant 0 : index
    %c0_19 = arith.constant 0 : index
    %23 = vector.load %arg8[%c0_17, %c0_18, %c0_19] : memref<1x1x128xf32, #tpu.memory_space<vmem>>, vector<1x1x128xf32>
    tpu.vector_store %arg8[%c0_17, %c0_18, %c0_19], %22 {strides = array<i32>} : memref<1x1x128xf32, #tpu.memory_space<vmem>>, vector<1x1x128xf32>,
    return
  }
  func.func @transform_0(%arg0: i32) -> (i32, i32) {
    %c0_i32 = arith.constant 0 : i32
    %c0_i32_0 = arith.constant 0 : i32
    return %arg0, %c0_i32 : i32, i32
  }
  func.func @transform_1(%arg0: i32) -> (i32, i32) {
    %c0_i32 = arith.constant 0 : i32
    %c0_i32_0 = arith.constant 0 : i32
    %c0_i32_1 = arith.constant 0 : i32
    return %c0_i32, %c0_i32_0 : i32, i32
  }
  func.func @transform_2(%arg0: i32) -> (i32, i32) {
    %c0_i32 = arith.constant 0 : i32
    %c0_i32_0 = arith.constant 0 : i32
    %c0_i32_1 = arith.constant 0 : i32
    return %c0_i32, %c0_i32_0 : i32, i32
  }
  func.func @transform_3(%arg0: i32) -> (i32, i32) {
    %c0_i32 = arith.constant 0 : i32
    %c0_i32_0 = arith.constant 0 : i32
    %c0_i32_1 = arith.constant 0 : i32
    return %c0_i32, %c0_i32_0 : i32, i32
  }
  func.func @transform_4(%arg0: i32) -> (i32, i32) {
    %c0_i32 = arith.constant 0 : i32
    %c0_i32_0 = arith.constant 0 : i32
    %c0_i32_1 = arith.constant 0 : i32
    return %c0_i32, %c0_i32_0 : i32, i32
  }
  func.func @transform_5(%arg0: i32) -> (i32, i32) {
    %c0_i32 = arith.constant 0 : i32
    %c0_i32_0 = arith.constant 0 : i32
    %c0_i32_1 = arith.constant 0 : i32
    return %c0_i32, %c0_i32_0 : i32, i32
  }
  func.func @transform_6(%arg0: i32) -> (i32, i32) {
    %c0_i32 = arith.constant 0 : i32
    %c0_i32_0 = arith.constant 0 : i32
    %c0_i32_1 = arith.constant 0 : i32
    return %c0_i32, %c0_i32_0 : i32, i32
  }
  func.func @transform_7(%arg0: i32) -> (i32, i32, i32) {
    %c0_i32 = arith.constant 0 : i32
    %c0_i32_0 = arith.constant 0 : i32
    %c0_i32_1 = arith.constant 0 : i32
    return %arg0, %c0_i32, %c0_i32_0 : i32, i32, i32
  }
}

</mosaic_0001>

<bundles_post_ra>
// kernel: f1_predictor_forward.1
= control target key start
LH: loop header
LB: loop body
LE: loop exit
PB: predicated region body
PF: predicated region fallthrough
CT: control target
= control target key end

     0   :  { %vm105_vm0 = vcmask 261120   ;;  %vm239_vm1 = vcmask 523264   ;;  %s613_s1 = inlined_call_operand.vmem [shape: bf16[32,64], index: 1, kind: input, shape index: {}]   ;;  %s614_s2 = inlined_call_operand.vmem [shape: f32[1,64], index: 2, kind: input, shape index: {}]   ;;  %s615_s0 = inlined_call_operand.vmem [shape: bf16[128,32], index: 0, kind: input, shape index: {}]   ;;  %s616_s3 = inlined_call_operand.vmem [shape: bf16[64,32], index: 3, kind: input, shape index: {}]   ;;  %s617_s4 = inlined_call_operand.vmem [shape: f32[1,32], index: 4, kind: input, shape index: {}]   ;;  %s618_s6 = inlined_call_operand.<no memory space> [shape: f32[1,1], index: 6, kind: input, shape index: {}]   ;;  %s619_s5 = inlined_call_operand.vmem [shape: bf16[1,32], index: 5, kind: input, shape index: {}]   ;;  %s620_s7 = inlined_call_operand.vmem [shape: f32[1,1,128], index: 7, kind: output, shape index: {}]  }
   0x1   :  { %v472_v0 = vld [vmem:[%s613_s1 + $0x8] sm:$0xff]  ;;  %v471_v1 = vld [vmem:[%s613_s1] sm:$0xff]  ;;  %v465_v4 = vld [vmem:[%s615_s0 + $0x10] sm:$0xff] }
   0x2   :  { %136 = vmatpush.bf16.msra.mxu0 %v472_v0  ;;  %477 = vmatpush.bf16.msra.mxu3 %v472_v0  ;;  %v463_v2 = vld [vmem:[%s615_s0] sm:$0xff]  ;;  %v464_v3 = vld [vmem:[%s615_s0 + $0x8] sm:$0xff]  ;;  %v466_v5 = vld [vmem:[%s615_s0 + $0x18] sm:$0xff] }
   0x3   :  { %v469_v6 = vld [vmem:[%s615_s0 + $0x30] sm:$0xff]  ;;  %v467_v7 = vld [vmem:[%s615_s0 + $0x20] sm:$0xff]  ;;  %v470_v8 = vld [vmem:[%s615_s0 + $0x38] sm:$0xff] }
   0x4   :  { %v468_v9 = vld [vmem:[%s615_s0 + $0x28] sm:$0xff]  ;;  %v476_v10 = vld [vmem:[%s616_s3 + $0x18] sm:$0xff]  ;;  %v475_v11 = vld [vmem:[%s616_s3 + $0x10] sm:$0xff] }
   0x5   :  { %268 = vmatpush.bf16.msra.mxu1 %v476_v10  ;;  %v474_v12 = vld [vmem:[%s616_s3 + $0x8] sm:$0xff]  ;;  %v473_v13 = vld [vmem:[%s616_s3] sm:$0xff] }
   0x6   :  { %137 = vmatpush.bf16.msra.mxu0 %v471_v1  ;;  %478 = vmatpush.bf16.msra.mxu3 %v471_v1  ;;  %v485_v15 = vld [vmem:[%s614_s2] ss:$0 sm:$0xff] }
   0x9   :  { %430 = vmatmul.msk.bf16.vlgmr.msra.gmra.mxu0 %vm105_vm0, %v463_v2  ;;  %436 = vmatmul.msk.bf16.vlgmr.msra.gmra.mxu3 %vm105_vm0, %v469_v6 }
   0xa   :  { %479 = vmatpush.bf16.msrb.mxu3 %v476_v10  ;;  %269 = vmatpush.bf16.msra.mxu1 %v475_v11 }
   0xe   :  { %480 = vmatpush.bf16.msrb.mxu3 %v475_v11  ;;  %270 = vmatpush.bf16.msra.mxu1 %v474_v12 }
  0x12   :  { %481 = vmatpush.bf16.msrb.mxu3 %v474_v12  ;;  %271 = vmatpush.bf16.msra.mxu1 %v473_v13 }
  0x16   :  { %482 = vmatpush.bf16.msrb.mxu3 %v473_v13 }
  0x19   :  { %431 = vmatmul.msk.bf16.gmra.mxu0 %vm105_vm0, %v464_v3  ;;  %437 = vmatmul.msk.bf16.gmra.mxu3 %vm105_vm0, %v470_v8  ;;  %v486_v8 = vld [vmem:[%s617_s4] ss:$0 sm:$0xff] }
  0x29   :  { %432 = vmatmul.msk.bf16.gmra.mxu0 %vm105_vm0, %v465_v4 }
  0x39   :  { %433 = vmatmul.msk.bf16.gmra.mxu0 %vm105_vm0, %v466_v5 }
  0x49   :  { %434 = vmatmul.msk.bf16.gmra.mxu0 %vm105_vm0, %v467_v7 }
  0x59   :  { %435 = vmatmul.msk.bf16.gmra.mxu0 %vm105_vm0, %v468_v9 }
  0x86   :  { %v139_v14 = vpop.f32.mrf.mxu0 }
  0x87   :  { %v140_v16 = vadd.f32 %v485_v15, %v139_v14 }
  0x89   :  { %v179_v19 = vmax.f32 %v140_v16, 0.0 }
  0x8c   :  { %v169_v51 = vpop.f32.mrf.mxu3 }
  0x8d   :  { %v170_v59 = vadd.f32 %v485_v15, %v169_v51 }
  0x8e   :  { %v141_v17 = vpop.f32.mrf.mxu0 }
  0x8f   :  { %v142_v18 = vadd.f32 %v485_v15, %v141_v17  ;;  %v191_v62 = vmax.f32 %v170_v59, 0.0 }
  0x91   :  { %v180_v20 = vmax.f32 %v142_v18, 0.0 }
  0x93   :  { %v195_v21 = vpack.c.bf16 %v180_v20, %v179_v19 }
  0x94   :  { %v171_v58 = vpop.f32.mrf.mxu3 }
  0x95   :  { %454 = vmatmul.msk.bf16.vlgmr.msra.gmra.mxu1 %vm239_vm1, %v195_v21  ;;  %v172_v60 = vadd.f32 %v485_v15, %v171_v58 }
  0x96   :  { %v144_v22 = vpop.f32.mrf.mxu0 }
  0x97   :  { %v145_v23 = vadd.f32 %v485_v15, %v144_v22  ;;  %v192_v63 = vmax.f32 %v172_v60, 0.0 }
  0x99   :  { %v181_v26 = vmax.f32 %v145_v23, 0.0  ;;  %v201_v0 = vpack.c.bf16 %v192_v63, %v191_v62 }
  0x9c   :  { %v174_v61 = vpop.f32.mrf.mxu3 }
  0x9d   :  { %v175_v2 = vadd.f32 %v485_v15, %v174_v61 }
  0x9e   :  { %v146_v24 = vpop.f32.mrf.mxu0 }
  0x9f   :  { %v147_v25 = vadd.f32 %v485_v15, %v146_v24  ;;  %v193_v4 = vmax.f32 %v175_v2, 0.0 }
  0xa1   :  { %v182_v27 = vmax.f32 %v147_v25, 0.0 }
  0xa3   :  { %v196_v28 = vpack.c.bf16 %v182_v27, %v181_v26 }
  0xa4   :  { %v176_v1 = vpop.f32.mrf.mxu3 }
  0xa5   :  { %455 = vmatmul.msk.bf16.gmra.mxu1 %vm239_vm1, %v196_v28  ;;  %v177_v3 = vadd.f32 %v485_v15, %v176_v1 }
  0xa6   :  { %v149_v29 = vpop.f32.mrf.mxu0 }
  0xa7   :  { %v150_v30 = vadd.f32 %v485_v15, %v149_v29  ;;  %v194_v5 = vmax.f32 %v177_v3, 0.0  ;;  %v12_v3 = vstv %s618_s6 }
  0xa8   :  { %13 = vst [vmem:[#allocation2] sm:$0x1] %v12_v3 }
  0xa9   :  { %v183_v33 = vmax.f32 %v150_v30, 0.0  ;;  %v202_v6 = vpack.c.bf16 %v194_v5, %v193_v4  ;;  %v487_v4 = vmov 0  }
  0xaa   :  { %484 = vset.pattern.permute.xlu0 %v487_v4 }
  0xae   :  { %v151_v31 = vpop.f32.mrf.mxu0 }
  0xaf   :  { %v152_v32 = vadd.f32 %v485_v15, %v151_v31 }
  0xb1   :  { %v184_v34 = vmax.f32 %v152_v32, 0.0 }
  0xb3   :  { %v197_v35 = vpack.c.bf16 %v184_v34, %v183_v33 }
  0xb5   :  { %456 = vmatmul.msk.bf16.gmra.mxu1 %vm239_vm1, %v197_v35 }
  0xb6   :  { %v154_v36 = vpop.f32.mrf.mxu0 }
  0xb7   :  { %v155_v37 = vadd.f32 %v485_v15, %v154_v36 }
  0xb9   :  { %v185_v40 = vmax.f32 %v155_v37, 0.0 }
  0xbe   :  { %v156_v38 = vpop.f32.mrf.mxu0 }
  0xbf   :  { %v157_v39 = vadd.f32 %v485_v15, %v156_v38 }
  0xc1   :  { %v186_v41 = vmax.f32 %v157_v39, 0.0 }
  0xc3   :  { %v198_v42 = vpack.c.bf16 %v186_v41, %v185_v40 }
  0xc5   :  { %457 = vmatmul.msk.bf16.gmra.mxu1 %vm239_vm1, %v198_v42 }
  0xc6   :  { %v159_v43 = vpop.f32.mrf.mxu0 }
  0xc7   :  { %v160_v44 = vadd.f32 %v485_v15, %v159_v43 }
  0xc9   :  { %v187_v47 = vmax.f32 %v160_v44, 0.0 }
  0xce   :  { %v161_v45 = vpop.f32.mrf.mxu0 }
  0xcf   :  { %v162_v46 = vadd.f32 %v485_v15, %v161_v45 }
  0xd1   :  { %v188_v48 = vmax.f32 %v162_v46, 0.0 }
  0xd3   :  { %v199_v49 = vpack.c.bf16 %v188_v48, %v187_v47 }
  0xd5   :  { %458 = vmatmul.msk.bf16.gmra.mxu1 %vm239_vm1, %v199_v49 }
  0xd6   :  { %v164_v50 = vpop.f32.mrf.mxu0 }
  0xd7   :  { %v165_v52 = vadd.f32 %v485_v15, %v164_v50 }
  0xd9   :  { %v189_v55 = vmax.f32 %v165_v52, 0.0 }
  0xde   :  { %v166_v53 = vpop.f32.mrf.mxu0 }
  0xdf   :  { %v167_v54 = vadd.f32 %v485_v15, %v166_v53 }
  0xe1   :  { %v190_v56 = vmax.f32 %v167_v54, 0.0 }
  0xe3   :  { %v200_v57 = vpack.c.bf16 %v190_v56, %v189_v55 }
  0xe5   :  { %459 = vmatmul.msk.bf16.vlgmr.msrb.gmra.mxu3 %vm239_vm1, %v200_v57 }
  0xf5   :  { %460 = vmatmul.msk.bf16.gmra.mxu3 %vm239_vm1, %v201_v0 }
 0x105   :  { %461 = vmatmul.msk.bf16.gmra.mxu3 %vm239_vm1, %v202_v6 }
 0x112   :  { %v273_v7 = vpop.f32.mrf.mxu1 }
 0x113   :  { %v274_v9 = vadd.f32 %v486_v8, %v273_v7 }
 0x115   :  { %v313_v12 = vmax.f32 %v274_v9, 0.0  ;;  %v338_v9 = vld [vmem:[#allocation2] sm:$0x1] }
 0x116   :  { %341 = vperm.xlu0 %484, %v338_v9  }
 0x11a   :  { %v275_v10 = vpop.f32.mrf.mxu1 }
 0x11b   :  { %v276_v11 = vadd.f32 %v486_v8, %v275_v10 }
 0x11d   :  { %v314_v13 = vmax.f32 %v276_v11, 0.0  ;;  %v329_v11 = vld [vmem:[%s619_s5] sm:$0x1] }
 0x11f   :  { %v592_v14 = vpack.c.bf16 %v314_v13, %v313_v12 }
 0x121   :  { %v349_v10 = vsel %vm105_vm0, %v592_v14, 0 }
 0x122   :  { %v278_v16 = vpop.f32.mrf.mxu1 }
 0x123   :  { %v279_v17 = vadd.f32 %v486_v8, %v278_v16 }
 0x125   :  { %v315_v19 = vmax.f32 %v279_v17, 0.0 }
 0x12a   :  { %v280_v15 = vpop.f32.mrf.mxu1 }
 0x12b   :  { %v281_v18 = vadd.f32 %v486_v8, %v280_v15 }
 0x12d   :  { %v316_v20 = vmax.f32 %v281_v18, 0.0 }
 0x12f   :  { %v331_v21 = vpack.c.bf16 %v316_v20, %v315_v19 }
 0x132   :  { %v283_v23 = vpop.f32.mrf.mxu1 }
 0x133   :  { %v284_v0 = vadd.f32 %v486_v8, %v283_v23 }
 0x135   :  { %v317_v5 = vmax.f32 %v284_v0, 0.0 }
 0x13a   :  { %v285_v25 = vpop.f32.mrf.mxu1 }
 0x13b   :  { %v286_v62 = vadd.f32 %v486_v8, %v285_v25 }
 0x13d   :  { %v318_v1 = vmax.f32 %v286_v62, 0.0 }
 0x13f   :  { %v332_v6 = vpack.c.bf16 %v318_v1, %v317_v5 }
 0x141   :  { %v355_v7 = vsel %vm105_vm0, %v332_v6, 0 }
 0x142   :  { %v288_v28 = vpop.f32.mrf.mxu1 }
 0x143   :  { %v289_v58 = vadd.f32 %v486_v8, %v288_v28 }
 0x145   :  { %v319_v61 = vmax.f32 %v289_v58, 0.0 }
 0x14a   :  { %v290_v30 = vpop.f32.mrf.mxu1 }
 0x14b   :  { %v291_v56 = vadd.f32 %v486_v8, %v290_v30 }
 0x14d   :  { %v320_v59 = vmax.f32 %v291_v56, 0.0 }
 0x14f   :  { %v333_v63 = vpack.c.bf16 %v320_v59, %v319_v61 }
 0x151   :  { %v358_v2 = vsel %vm105_vm0, %v333_v63, 0 }
 0x152   :  { %v293_v39 = vpop.f32.mrf.mxu1 }
 0x153   :  { %v294_v52 = vadd.f32 %v486_v8, %v293_v39 }
 0x155   :  { %v321_v55 = vmax.f32 %v294_v52, 0.0 }
 0x15a   :  { %v295_v48 = vpop.f32.mrf.mxu1 }
 0x15b   :  { %v296_v50 = vadd.f32 %v486_v8, %v295_v48 }
 0x15d   :  { %v322_v53 = vmax.f32 %v296_v50, 0.0 }
 0x15f   :  { %v334_v57 = vpack.c.bf16 %v322_v53, %v321_v55 }
 0x161   :  { %v361_v60 = vsel %vm105_vm0, %v334_v57, 0 }
 0x168   :  { %v298_v22 = vpop.f32.mrf.mxu3 }
 0x169   :  { %v299_v45 = vadd.f32 %v486_v8, %v298_v22 }
 0x16b   :  { %v323_v49 = vmax.f32 %v299_v45, 0.0 }
 0x170   :  { %v300_v24 = vpop.f32.mrf.mxu3 }
 0x171   :  { %v301_v43 = vadd.f32 %v486_v8, %v300_v24 }
 0x173   :  { %v324_v46 = vmax.f32 %v301_v43, 0.0 }
 0x175   :  { %v335_v51 = vpack.c.bf16 %v324_v46, %v323_v49 }
 0x177   :  { %v364_v54 = vsel %vm105_vm0, %v335_v51, 0 }
 0x178   :  { %v303_v26 = vpop.f32.mrf.mxu3 }
 0x179   :  { %v304_v37 = vadd.f32 %v486_v8, %v303_v26 }
 0x17b   :  { %v325_v42 = vmax.f32 %v304_v37, 0.0 }
 0x180   :  { %v305_v27 = vpop.f32.mrf.mxu3 }
 0x181   :  { %v306_v34 = vadd.f32 %v486_v8, %v305_v27 }
 0x183   :  { %v326_v40 = vmax.f32 %v306_v34, 0.0 }
 0x185   :  { %v336_v44 = vpack.c.bf16 %v326_v40, %v325_v42 }
 0x187   :  { %v367_v47 = vsel %vm105_vm0, %v336_v44, 0 }
 0x188   :  { %v308_v29 = vpop.f32.mrf.mxu3  ;;  %v342_v12 = vpop.permute.xlu0 %341 }
 0x189   :  { %v309_v31 = vadd.f32 %v486_v8, %v308_v29  ;;  %v344_v13 = vperm.slane %v342_v12, 0 }
 0x18b   :  { %v327_v35 = vmax.f32 %v309_v31, 0.0 }
 0x190   :  { %v310_v32 = vpop.f32.mrf.mxu3 }
 0x191   :  { %v311_v33 = vadd.f32 %v486_v8, %v310_v32  ;;  %v352_v8 = vsel %vm105_vm0, %v331_v21, 0 }
 0x193   :  { %v328_v36 = vmax.f32 %v311_v33, 0.0 }
 0x195   :  { %v337_v38 = vpack.c.bf16 %v328_v36, %v327_v35 }
 0x197   :  { %v370_v41 = vsel %vm105_vm0, %v337_v38, 0 }
 0x198   :  { %372 = vmatpush.bf16.xpose.msra.mxu2 %v370_v41 }
 0x1a0   :  { %373 = vmatpush.bf16.xpose.msra.mxu2 %v367_v47 }
 0x1a8   :  { %374 = vmatpush.bf16.xpose.msra.mxu2 %v364_v54 }
 0x1b0   :  { %375 = vmatpush.bf16.xpose.msra.mxu2 %v361_v60 }
 0x1b8   :  { %376 = vmatpush.bf16.xpose.msra.mxu2 %v358_v2 }
 0x1c0   :  { %377 = vmatpush.bf16.xpose.msra.mxu2 %v355_v7 }
 0x1c8   :  { %378 = vmatpush.bf16.xpose.msra.mxu2 %v352_v8 }
 0x1d0   :  { %379 = vmatpush.bf16.xpose.msra.mxu2 %v349_v10 }
 0x1d7   :  { %462 = vmatmul.msk.bf16.vlgmr.msra.gmra.mxu2 %vm105_vm0, %v329_v11 }
 0x25a   :  { %v381_v16 = vpop.f32.mrf.mxu2 }
 0x25b   :  { %v382_v17 = vadd.f32 %v381_v16, %v344_v13 }
 0x25d   :  { %385 = vst [vmem:[%s620_s7] sm:$0x1] %v382_v17 }
 0x262   :  { %v383_v15 = vpop.f32.mrf.mxu2 }

</bundles_post_ra>
